<compile_context>
chip_gen: v7x
topology: tpu7x:2x2x1
jax: 0.10.0
libtpu: 0.0.40
codegen_flags: <defaults>
</compile_context>

<pallas_src>
import functools

import jax
import jax.numpy as jnp
from jax.experimental import pallas as pl


# ----------------------------- Pallas kernel ------------------------------ #
def _rwmh_kernel(chains0_ref, w1_ref, b1_ref, w2t_ref,
                 noise_ref, logu_ref, xnoise_ref, xlogu_ref,
                 values_ref, acc_ref, chains_ref, logp_ref,
                 *, n_warm_blocks, thinning, n_tail):
    """One grid step = `thinning` MH updates (+ init / tail work at the ends)."""
    nwalkers, dim = chains0_ref.shape
    g = pl.program_id(0)
    n_blocks = pl.num_programs(0)

    # Weights stay VMEM-resident across the whole grid (constant index maps).
    w1 = w1_ref[...]                       # (dim, hidden)
    b1 = b1_ref[...]                       # (1, hidden)
    w2t = w2t_ref[...]                     # (1, hidden)  == w2.T

    def log_pdf(x):
        h = jnp.tanh(jnp.dot(x, w1, preferred_element_type=jnp.float32) + b1)
        # N=1 output: lane reduction instead of a wasted MXU pass.  b2 omitted
        # on purpose (constant offset cancels in logp_cand - logp).
        return 2.0 * jnp.sum(h * w2t, axis=-1, keepdims=True)     # (nwalkers, 1)

    def mh_step(chains, logp, nacc, noise, log_u):
        xcand = chains + noise                        # proposal (std folded in)
        logp_cand = log_pdf(xcand)                    # ONE network eval / step
        accept = log_u < (logp_cand - logp)           # (nwalkers, 1) bool
        chains = jnp.where(accept, xcand, chains)
        logp = jnp.where(accept, logp_cand, logp)
        return chains, logp, nacc + accept.astype(jnp.int32)

    zero_cnt = jnp.zeros((nwalkers, 1), jnp.int32)

    # ---- grid step 0: init carried state + the single leading MH step -------
    @pl.when(g == 0)
    def _init():
        c0 = chains0_ref[...]
        c, lp, na = mh_step(c0, log_pdf(c0), zero_cnt,
                            xnoise_ref[0], xlogu_ref[0])
        chains_ref[...] = c
        logp_ref[...] = lp
        acc_ref[...] = na

    # ---- `thinning` MH steps, fully unrolled (one large basic block) --------
    chains = chains_ref[...]
    logp = logp_ref[...]
    nacc = zero_cnt
    for t in range(thinning):                         # static unroll
        chains, logp, nacc = mh_step(chains, logp, nacc,
                                     noise_ref[0, t], logu_ref[0, t])
    chains_ref[...] = chains
    logp_ref[...] = logp
    acc_ref[...] += nacc

    # ---- store one thinned sample per post-burn-in grid step ---------------
    @pl.when(g >= n_warm_blocks)
    def _store():
        values_ref[0] = chains

    # ---- trailing steps: acceptance bookkeeping only (matches reference) ----
    if n_tail > 0:                                    # static
        @pl.when(g == n_blocks - 1)
        def _tail():
            c, lp, na = chains, logp, zero_cnt
            for t in range(n_tail):
                c, lp, na = mh_step(c, lp, na, xnoise_ref[1 + t], xlogu_ref[1 + t])
            chains_ref[...] = c
            logp_ref[...] = lp
            acc_ref[...] += na


# ----------------------------- JAX-side glue ------------------------------ #
def init_network_params(key, dim, hidden):
    k1, k2, k3, k4 = jax.random.split(key, 4)
    w1 = jax.random.normal(k1, (dim, hidden), jnp.float32) * 0.1
    b1 = jax.random.normal(k2, (1, hidden), jnp.float32) * 0.01
    w2 = jax.random.normal(k3, (hidden, 1), jnp.float32) * 0.1
    b2 = jax.random.normal(k4, (1, 1), jnp.float32) * 0.01
    return w1, b1, w2, b2


def rwmh_forward(chains0, params, *, nsamples, burn_in, thinning, std, key):
    """Replicates RandomWalkMetropolisHastings.forward(nsamples, burn_in, thinning)."""
    chains0 = jnp.asarray(chains0, jnp.float32)
    nwalkers, dim = chains0.shape
    w1, b1, w2, _b2 = params              # b2 cancels in the MH acceptance ratio
    hidden = w1.shape[1]

    total_samples = thinning * (nsamples + 1) + burn_in
    # Two-level schedule, equivalent to the reference `i > burn_in and
    # i % thinning == 0` storage rule (the idx == -1 wrap store in the torch
    # code is always overwritten later, so it can be skipped):
    #   1 leading step, then (n_warm_blocks + nsamples) blocks of `thinning`
    #   steps (a thinned sample is recorded at the end of each of the last
    #   `nsamples` blocks), then `n_tail` trailing steps.
    n_warm_blocks = -(-burn_in // thinning)                 # ceil(burn_in/thinning)
    n_blocks = n_warm_blocks + nsamples
    n_tail = total_samples - 1 - thinning * n_blocks        # in [0, thinning)
    n_extra = 1 + n_tail

    # Host-generated randomness, streamed block-by-block into the kernel.
    kn, ku, kxn, kxu = jax.random.split(key, 4)
    tiny = 1e-37
    noise = std * jax.random.normal(kn, (n_blocks, thinning, nwalkers, dim), jnp.float32)
    logu = jnp.log(jax.random.uniform(ku, (n_blocks, thinning, nwalkers, 1),
                                      jnp.float32, minval=tiny, maxval=1.0))
    xnoise = std * jax.random.normal(kxn, (n_extra, nwalkers, dim), jnp.float32)
    xlogu = jnp.log(jax.random.uniform(kxu, (n_extra, nwalkers, 1),
                                       jnp.float32, minval=tiny, maxval=1.0))

    kernel = functools.partial(_rwmh_kernel, n_warm_blocks=n_warm_blocks,
                               thinning=thinning, n_tail=n_tail)

    values_t, acc_counts, _chains_fin, _logp_fin = pl.pallas_call(
        kernel,
        grid=(n_blocks,),
        in_specs=[
            pl.BlockSpec((nwalkers, dim), lambda g: (0, 0)),             # chains0
            pl.BlockSpec((dim, hidden), lambda g: (0, 0)),               # W1
            pl.BlockSpec((1, hidden), lambda g: (0, 0)),                 # b1
            pl.BlockSpec((1, hidden), lambda g: (0, 0)),                 # w2^T
            pl.BlockSpec((1, thinning, nwalkers, dim), lambda g: (g, 0, 0, 0)),
            pl.BlockSpec((1, thinning, nwalkers, 1), lambda g: (g, 0, 0, 0)),
            pl.BlockSpec((n_extra, nwalkers, dim), lambda g: (0, 0, 0)),
            pl.BlockSpec((n_extra, nwalkers, 1), lambda g: (0, 0, 0)),
        ],
        out_specs=(
            # one (nwalkers, dim) thinned-sample block per post-burn-in step
            pl.BlockSpec((1, nwalkers, dim),
                         lambda g: (jnp.maximum(g - n_warm_blocks, 0), 0, 0)),
            # VMEM-resident accumulators / carried chain state (constant index)
            pl.BlockSpec((nwalkers, 1), lambda g: (0, 0)),
            pl.BlockSpec((nwalkers, dim), lambda g: (0, 0)),
            pl.BlockSpec((nwalkers, 1), lambda g: (0, 0)),
        ),
        out_shape=(
            jax.ShapeDtypeStruct((nsamples, nwalkers, dim), jnp.float32),
            jax.ShapeDtypeStruct((nwalkers, 1), jnp.int32),
            jax.ShapeDtypeStruct((nwalkers, dim), jnp.float32),
            jax.ShapeDtypeStruct((nwalkers, 1), jnp.float32),
        ),
    )(chains0, w1, b1, w2.reshape(1, hidden), noise, logu, xnoise, xlogu)

    values = jnp.transpose(values_t, (1, 0, 2))       # (nwalkers, nsamples, dim)
    acceptance_pct = 100.0 * acc_counts[:, 0].astype(jnp.float32) / float(total_samples)
    return values, acceptance_pct


# --------------------------------- main ----------------------------------- #
if __name__ == "__main__":
    nwalkers, dim, hidden = 8, 16, 32     # nwalkers * dim == 128 (one vreg row)
    std = 0.5
    nsamples, burn_in, thinning = 3, 2, 2

    root = jax.random.PRNGKey(0)
    k_net, k_init, k_mcmc = jax.random.split(root, 3)

    params = init_network_params(k_net, dim, hidden)
    # _init_chains(): normal(mean=0, std=1)
    chains0 = jax.random.normal(k_init, (nwalkers, dim), jnp.float32)

    values, acceptance_pct = rwmh_forward(
        chains0, params,
        nsamples=nsamples, burn_in=burn_in, thinning=thinning,
        std=std, key=k_mcmc,
    )
    jax.block_until_ready((values, acceptance_pct))

    assert values.shape == (nwalkers, nsamples, dim)
    assert acceptance_pct.shape == (nwalkers,)
    assert bool(jnp.all(jnp.isfinite(values)))
    assert bool(jnp.all(acceptance_pct >= 0.0)) and bool(jnp.all(acceptance_pct <= 100.0))
    print("KERNEL_OK")
</pallas_src>

<mosaic_0001>
module attributes {stable_mosaic.version = 11 : i64} {
  func.func @_rwmh_kernel(%arg0: i32, %arg1: memref<8x16xf32, #tpu.memory_space<vmem>>, %arg2: memref<16x32xf32, #tpu.memory_space<vmem>>, %arg3: memref<1x32xf32, #tpu.memory_space<vmem>>, %arg4: memref<1x32xf32, #tpu.memory_space<vmem>>, %arg5: memref<1x2x8x16xf32, #tpu.memory_space<vmem>>, %arg6: memref<1x2x8x1xf32, #tpu.memory_space<vmem>>, %arg7: memref<2x8x16xf32, #tpu.memory_space<vmem>>, %arg8: memref<2x8x1xf32, #tpu.memory_space<vmem>>, %arg9: memref<1x8x16xf32, #tpu.memory_space<vmem>>, %arg10: memref<8x1xi32, #tpu.memory_space<vmem>>, %arg11: memref<8x16xf32, #tpu.memory_space<vmem>>, %arg12: memref<8x1xf32, #tpu.memory_space<vmem>>) attributes {dimension_semantics = [#tpu.dimension_semantics<arbitrary>], iteration_bounds = array<i64: 4>, scalar_prefetch = 0 : i64, scratch_operands = 0 : i64, tpu.core_type = #tpu.core_type<tc>, window_params = [{pipeline_mode = #tpu.pipeline_mode<synchronous>, transform_indices = @transform_0, window_bounds = array<i64: 8, 16>}, {pipeline_mode = #tpu.pipeline_mode<synchronous>, transform_indices = @transform_1, window_bounds = array<i64: 16, 32>}, {pipeline_mode = #tpu.pipeline_mode<synchronous>, transform_indices = @transform_2, window_bounds = array<i64: 1, 32>}, {pipeline_mode = #tpu.pipeline_mode<synchronous>, transform_indices = @transform_3, window_bounds = array<i64: 1, 32>}, {transform_indices = @transform_4, window_bounds = array<i64: 1, 2, 8, 16>}, {transform_indices = @transform_5, window_bounds = array<i64: 1, 2, 8, 1>}, {pipeline_mode = #tpu.pipeline_mode<synchronous>, transform_indices = @transform_6, window_bounds = array<i64: 2, 8, 16>}, {pipeline_mode = #tpu.pipeline_mode<synchronous>, transform_indices = @transform_7, window_bounds = array<i64: 2, 8, 1>}, {transform_indices = @transform_8, window_bounds = array<i64: 1, 8, 16>}, {pipeline_mode = #tpu.pipeline_mode<synchronous>, transform_indices = @transform_9, window_bounds = array<i64: 8, 1>}, {pipeline_mode = #tpu.pipeline_mode<synchronous>, transform_indices = @transform_10, window_bounds = array<i64: 8, 16>}, {pipeline_mode = #tpu.pipeline_mode<synchronous>, transform_indices = @transform_11, window_bounds = array<i64: 8, 1>}]} {
    %c0 = arith.constant 0 : index
    %c0_0 = arith.constant 0 : index
    %0 = vector.load %arg2[%c0, %c0_0] : memref<16x32xf32, #tpu.memory_space<vmem>>, vector<16x32xf32>
    %c0_1 = arith.constant 0 : index
    %c0_2 = arith.constant 0 : index
    %1 = vector.load %arg3[%c0_1, %c0_2] : memref<1x32xf32, #tpu.memory_space<vmem>>, vector<1x32xf32>
    %c0_3 = arith.constant 0 : index
    %c0_4 = arith.constant 0 : index
    %2 = vector.load %arg4[%c0_3, %c0_4] : memref<1x32xf32, #tpu.memory_space<vmem>>, vector<1x32xf32>
    %c0_i32 = arith.constant 0 : i32
    %3 = vector.broadcast %c0_i32 : i32 to vector<8x1xi32>
    %c0_i32_5 = arith.constant 0 : i32
    %4 = arith.cmpi eq, %arg0, %c0_i32_5 : i32
    %5 = arith.extui %4 : i1 to i32
    %c0_i32_6 = arith.constant 0 : i32
    %6 = arith.cmpi ne, %5, %c0_i32_6 : i32
    scf.if %6 {
      %c0_41 = arith.constant 0 : index
      %c0_42 = arith.constant 0 : index
      %66 = vector.load %arg1[%c0_41, %c0_42] : memref<8x16xf32, #tpu.memory_space<vmem>>, vector<8x16xf32>
      %cst_43 = arith.constant dense<0.000000e+00> : vector<8x32xf32>
      %67 = tpu.matmul %66, %0, %cst_43 {dimension_numbers = #tpu.dot_dimension_numbers<[1], [0], [0], [1], [0, 0, 1, 1], [], []>} : vector<8x16xf32>, vector<16x32xf32>, vector<8x32xf32> -> vector<8x32xf32>
      %68 = vector.broadcast %1 : vector<1x32xf32> to vector<8x32xf32>
      %69 = arith.addf %67, %68 : vector<8x32xf32>
      %70 = math.tanh %69 : vector<8x32xf32>
      %71 = vector.broadcast %2 : vector<1x32xf32> to vector<8x32xf32>
      %72 = arith.mulf %70, %71 : vector<8x32xf32>
      %cst_44 = arith.constant dense<0.000000e+00> : vector<8xf32>
      %73 = vector.multi_reduction <add>, %72, %cst_44 [1] : vector<8x32xf32> to vector<8xf32>
      %74 = vector.shape_cast %73 : vector<8xf32> to vector<8x1xf32>
      %cst_45 = arith.constant 2.000000e+00 : f32
      %75 = vector.broadcast %cst_45 : f32 to vector<8x1xf32>
      %76 = arith.mulf %75, %74 : vector<8x1xf32>
      %c0_46 = arith.constant 0 : index
      %c0_47 = arith.constant 0 : index
      %c0_48 = arith.constant 0 : index
      %77 = vector.load %arg7[%c0_46, %c0_47, %c0_48] : memref<2x8x16xf32, #tpu.memory_space<vmem>>, vector<1x8x16xf32>
      %78 = vector.shape_cast %77 : vector<1x8x16xf32> to vector<8x16xf32>
      %c0_49 = arith.constant 0 : index
      %c0_50 = arith.constant 0 : index
      %c0_51 = arith.constant 0 : index
      %79 = vector.load %arg8[%c0_49, %c0_50, %c0_51] : memref<2x8x1xf32, #tpu.memory_space<vmem>>, vector<1x8x1xf32>
      %80 = vector.shape_cast %79 : vector<1x8x1xf32> to vector<8x1xf32>
      %81 = arith.addf %66, %78 : vector<8x16xf32>
      %cst_52 = arith.constant dense<0.000000e+00> : vector<8x32xf32>
      %82 = tpu.matmul %81, %0, %cst_52 {dimension_numbers = #tpu.dot_dimension_numbers<[1], [0], [0], [1], [0, 0, 1, 1], [], []>} : vector<8x16xf32>, vector<16x32xf32>, vector<8x32xf32> -> vector<8x32xf32>
      %83 = vector.broadcast %1 : vector<1x32xf32> to vector<8x32xf32>
      %84 = arith.addf %82, %83 : vector<8x32xf32>
      %85 = math.tanh %84 : vector<8x32xf32>
      %86 = vector.broadcast %2 : vector<1x32xf32> to vector<8x32xf32>
      %87 = arith.mulf %85, %86 : vector<8x32xf32>
      %cst_53 = arith.constant dense<0.000000e+00> : vector<8xf32>
      %88 = vector.multi_reduction <add>, %87, %cst_53 [1] : vector<8x32xf32> to vector<8xf32>
      %89 = vector.shape_cast %88 : vector<8xf32> to vector<8x1xf32>
      %cst_54 = arith.constant 2.000000e+00 : f32
      %90 = vector.broadcast %cst_54 : f32 to vector<8x1xf32>
      %91 = arith.mulf %90, %89 : vector<8x1xf32>
      %92 = arith.subf %91, %76 : vector<8x1xf32>
      %93 = arith.cmpf olt, %80, %92 : vector<8x1xf32>
      %94 = vector.shape_cast %93 : vector<8x1xi1> to vector<8x1xi1>
      %95 = vector.broadcast %94 : vector<8x1xi1> to vector<8x16xi1>
      %96 = arith.select %95, %81, %66 : vector<8x16xi1>, vector<8x16xf32>
      %97 = arith.select %93, %91, %76 : vector<8x1xi1>, vector<8x1xf32>
      %98 = arith.extui %93 : vector<8x1xi1> to vector<8x1xi32>
      %99 = arith.addi %3, %98 : vector<8x1xi32>
      %c0_55 = arith.constant 0 : index
      %c0_56 = arith.constant 0 : index
      %100 = vector.load %arg11[%c0_55, %c0_56] : memref<8x16xf32, #tpu.memory_space<vmem>>, vector<8x16xf32>
      tpu.vector_store %arg11[%c0_55, %c0_56], %96 {strides = array<i32>} : memref<8x16xf32, #tpu.memory_space<vmem>>, vector<8x16xf32>,
      %c0_57 = arith.constant 0 : index
      %c0_58 = arith.constant 0 : index
      %101 = vector.load %arg12[%c0_57, %c0_58] : memref<8x1xf32, #tpu.memory_space<vmem>>, vector<8x1xf32>
      tpu.vector_store %arg12[%c0_57, %c0_58], %97 {strides = array<i32>} : memref<8x1xf32, #tpu.memory_space<vmem>>, vector<8x1xf32>,
      %c0_59 = arith.constant 0 : index
      %c0_60 = arith.constant 0 : index
      %102 = vector.load %arg10[%c0_59, %c0_60] : memref<8x1xi32, #tpu.memory_space<vmem>>, vector<8x1xi32>
      tpu.vector_store %arg10[%c0_59, %c0_60], %99 {strides = array<i32>} : memref<8x1xi32, #tpu.memory_space<vmem>>, vector<8x1xi32>,
    } else {
    }
    %c0_7 = arith.constant 0 : index
    %c0_8 = arith.constant 0 : index
    %7 = vector.load %arg11[%c0_7, %c0_8] : memref<8x16xf32, #tpu.memory_space<vmem>>, vector<8x16xf32>
    %c0_9 = arith.constant 0 : index
    %c0_10 = arith.constant 0 : index
    %8 = vector.load %arg12[%c0_9, %c0_10] : memref<8x1xf32, #tpu.memory_space<vmem>>, vector<8x1xf32>
    %c0_11 = arith.constant 0 : index
    %c0_12 = arith.constant 0 : index
    %c0_13 = arith.constant 0 : index
    %c0_14 = arith.constant 0 : index
    %9 = vector.load %arg5[%c0_11, %c0_12, %c0_13, %c0_14] : memref<1x2x8x16xf32, #tpu.memory_space<vmem>>, vector<1x1x8x16xf32>
    %10 = vector.shape_cast %9 : vector<1x1x8x16xf32> to vector<8x16xf32>
    %c0_15 = arith.constant 0 : index
    %c0_16 = arith.constant 0 : index
    %c0_17 = arith.constant 0 : index
    %c0_18 = arith.constant 0 : index
    %11 = vector.load %arg6[%c0_15, %c0_16, %c0_17, %c0_18] : memref<1x2x8x1xf32, #tpu.memory_space<vmem>>, vector<1x1x8x1xf32>
    %12 = vector.shape_cast %11 : vector<1x1x8x1xf32> to vector<8x1xf32>
    %13 = arith.addf %7, %10 : vector<8x16xf32>
    %cst = arith.constant dense<0.000000e+00> : vector<8x32xf32>
    %14 = tpu.matmul %13, %0, %cst {dimension_numbers = #tpu.dot_dimension_numbers<[1], [0], [0], [1], [0, 0, 1, 1], [], []>} : vector<8x16xf32>, vector<16x32xf32>, vector<8x32xf32> -> vector<8x32xf32>
    %15 = vector.broadcast %1 : vector<1x32xf32> to vector<8x32xf32>
    %16 = arith.addf %14, %15 : vector<8x32xf32>
    %17 = math.tanh %16 : vector<8x32xf32>
    %18 = vector.broadcast %2 : vector<1x32xf32> to vector<8x32xf32>
    %19 = arith.mulf %17, %18 : vector<8x32xf32>
    %cst_19 = arith.constant dense<0.000000e+00> : vector<8xf32>
    %20 = vector.multi_reduction <add>, %19, %cst_19 [1] : vector<8x32xf32> to vector<8xf32>
    %21 = vector.shape_cast %20 : vector<8xf32> to vector<8x1xf32>
    %cst_20 = arith.constant 2.000000e+00 : f32
    %22 = vector.broadcast %cst_20 : f32 to vector<8x1xf32>
    %23 = arith.mulf %22, %21 : vector<8x1xf32>
    %24 = arith.subf %23, %8 : vector<8x1xf32>
    %25 = arith.cmpf olt, %12, %24 : vector<8x1xf32>
    %26 = vector.shape_cast %25 : vector<8x1xi1> to vector<8x1xi1>
    %27 = vector.broadcast %26 : vector<8x1xi1> to vector<8x16xi1>
    %28 = arith.select %27, %13, %7 : vector<8x16xi1>, vector<8x16xf32>
    %29 = arith.select %25, %23, %8 : vector<8x1xi1>, vector<8x1xf32>
    %30 = arith.extui %25 : vector<8x1xi1> to vector<8x1xi32>
    %31 = arith.addi %3, %30 : vector<8x1xi32>
    %c0_21 = arith.constant 0 : index
    %c1 = arith.constant 1 : index
    %c0_22 = arith.constant 0 : index
    %c0_23 = arith.constant 0 : index
    %32 = vector.load %arg5[%c0_21, %c1, %c0_22, %c0_23] : memref<1x2x8x16xf32, #tpu.memory_space<vmem>>, vector<1x1x8x16xf32>
    %33 = vector.shape_cast %32 : vector<1x1x8x16xf32> to vector<8x16xf32>
    %c0_24 = arith.constant 0 : index
    %c1_25 = arith.constant 1 : index
    %c0_26 = arith.constant 0 : index
    %c0_27 = arith.constant 0 : index
    %34 = vector.load %arg6[%c0_24, %c1_25, %c0_26, %c0_27] : memref<1x2x8x1xf32, #tpu.memory_space<vmem>>, vector<1x1x8x1xf32>
    %35 = vector.shape_cast %34 : vector<1x1x8x1xf32> to vector<8x1xf32>
    %36 = arith.addf %28, %33 : vector<8x16xf32>
    %cst_28 = arith.constant dense<0.000000e+00> : vector<8x32xf32>
    %37 = tpu.matmul %36, %0, %cst_28 {dimension_numbers = #tpu.dot_dimension_numbers<[1], [0], [0], [1], [0, 0, 1, 1], [], []>} : vector<8x16xf32>, vector<16x32xf32>, vector<8x32xf32> -> vector<8x32xf32>
    %38 = vector.broadcast %1 : vector<1x32xf32> to vector<8x32xf32>
    %39 = arith.addf %37, %38 : vector<8x32xf32>
    %40 = math.tanh %39 : vector<8x32xf32>
    %41 = vector.broadcast %2 : vector<1x32xf32> to vector<8x32xf32>
    %42 = arith.mulf %40, %41 : vector<8x32xf32>
    %cst_29 = arith.constant dense<0.000000e+00> : vector<8xf32>
    %43 = vector.multi_reduction <add>, %42, %cst_29 [1] : vector<8x32xf32> to vector<8xf32>
    %44 = vector.shape_cast %43 : vector<8xf32> to vector<8x1xf32>
    %cst_30 = arith.constant 2.000000e+00 : f32
    %45 = vector.broadcast %cst_30 : f32 to vector<8x1xf32>
    %46 = arith.mulf %45, %44 : vector<8x1xf32>
    %47 = arith.subf %46, %29 : vector<8x1xf32>
    %48 = arith.cmpf olt, %35, %47 : vector<8x1xf32>
    %49 = vector.shape_cast %48 : vector<8x1xi1> to vector<8x1xi1>
    %50 = vector.broadcast %49 : vector<8x1xi1> to vector<8x16xi1>
    %51 = arith.select %50, %36, %28 : vector<8x16xi1>, vector<8x16xf32>
    %52 = arith.select %48, %46, %29 : vector<8x1xi1>, vector<8x1xf32>
    %53 = arith.extui %48 : vector<8x1xi1> to vector<8x1xi32>
    %54 = arith.addi %31, %53 : vector<8x1xi32>
    %c0_31 = arith.constant 0 : index
    %c0_32 = arith.constant 0 : index
    %55 = vector.load %arg11[%c0_31, %c0_32] : memref<8x16xf32, #tpu.memory_space<vmem>>, vector<8x16xf32>
    tpu.vector_store %arg11[%c0_31, %c0_32], %51 {strides = array<i32>} : memref<8x16xf32, #tpu.memory_space<vmem>>, vector<8x16xf32>,
    %c0_33 = arith.constant 0 : index
    %c0_34 = arith.constant 0 : index
    %56 = vector.load %arg12[%c0_33, %c0_34] : memref<8x1xf32, #tpu.memory_space<vmem>>, vector<8x1xf32>
    tpu.vector_store %arg12[%c0_33, %c0_34], %52 {strides = array<i32>} : memref<8x1xf32, #tpu.memory_space<vmem>>, vector<8x1xf32>,
    %c0_35 = arith.constant 0 : index
    %c0_36 = arith.constant 0 : index
    %57 = vector.load %arg10[%c0_35, %c0_36] : memref<8x1xi32, #tpu.memory_space<vmem>>, vector<8x1xi32>
    %58 = arith.addi %57, %54 : vector<8x1xi32>
    %c0_37 = arith.constant 0 : index
    %c0_38 = arith.constant 0 : index
    %59 = vector.load %arg10[%c0_37, %c0_38] : memref<8x1xi32, #tpu.memory_space<vmem>>, vector<8x1xi32>
    tpu.vector_store %arg10[%c0_37, %c0_38], %58 {strides = array<i32>} : memref<8x1xi32, #tpu.memory_space<vmem>>, vector<8x1xi32>,
    %c1_i32 = arith.constant 1 : i32
    %60 = arith.cmpi sge, %arg0, %c1_i32 : i32
    %61 = arith.extui %60 : i1 to i32
    %c0_i32_39 = arith.constant 0 : i32
    %62 = arith.cmpi ne, %61, %c0_i32_39 : i32
    scf.if %62 {
      %c0_41 = arith.constant 0 : index
      %c0_42 = arith.constant 0 : index
      %c0_43 = arith.constant 0 : index
      %66 = vector.load %arg9[%c0_41, %c0_42, %c0_43] : memref<1x8x16xf32, #tpu.memory_space<vmem>>, vector<1x8x16xf32>
      %67 = vector.shape_cast %66 : vector<1x8x16xf32> to vector<8x16xf32>
      %68 = vector.shape_cast %51 : vector<8x16xf32> to vector<1x8x16xf32>
      tpu.vector_store %arg9[%c0_41, %c0_42, %c0_43], %68 {strides = array<i32>} : memref<1x8x16xf32, #tpu.memory_space<vmem>>, vector<1x8x16xf32>,
    } else {
    }
    %c3_i32 = arith.constant 3 : i32
    %63 = arith.cmpi eq, %arg0, %c3_i32 : i32
    %64 = arith.extui %63 : i1 to i32
    %c0_i32_40 = arith.constant 0 : i32
    %65 = arith.cmpi ne, %64, %c0_i32_40 : i32
    scf.if %65 {
      %c1_41 = arith.constant 1 : index
      %c0_42 = arith.constant 0 : index
      %c0_43 = arith.constant 0 : index
      %66 = vector.load %arg7[%c1_41, %c0_42, %c0_43] : memref<2x8x16xf32, #tpu.memory_space<vmem>>, vector<1x8x16xf32>
      %67 = vector.shape_cast %66 : vector<1x8x16xf32> to vector<8x16xf32>
      %c1_44 = arith.constant 1 : index
      %c0_45 = arith.constant 0 : index
      %c0_46 = arith.constant 0 : index
      %68 = vector.load %arg8[%c1_44, %c0_45, %c0_46] : memref<2x8x1xf32, #tpu.memory_space<vmem>>, vector<1x8x1xf32>
      %69 = vector.shape_cast %68 : vector<1x8x1xf32> to vector<8x1xf32>
      %70 = arith.addf %51, %67 : vector<8x16xf32>
      %cst_47 = arith.constant dense<0.000000e+00> : vector<8x32xf32>
      %71 = tpu.matmul %70, %0, %cst_47 {dimension_numbers = #tpu.dot_dimension_numbers<[1], [0], [0], [1], [0, 0, 1, 1], [], []>} : vector<8x16xf32>, vector<16x32xf32>, vector<8x32xf32> -> vector<8x32xf32>
      %72 = vector.broadcast %1 : vector<1x32xf32> to vector<8x32xf32>
      %73 = arith.addf %71, %72 : vector<8x32xf32>
      %74 = math.tanh %73 : vector<8x32xf32>
      %75 = vector.broadcast %2 : vector<1x32xf32> to vector<8x32xf32>
      %76 = arith.mulf %74, %75 : vector<8x32xf32>
      %cst_48 = arith.constant dense<0.000000e+00> : vector<8xf32>
      %77 = vector.multi_reduction <add>, %76, %cst_48 [1] : vector<8x32xf32> to vector<8xf32>
      %78 = vector.shape_cast %77 : vector<8xf32> to vector<8x1xf32>
      %cst_49 = arith.constant 2.000000e+00 : f32
      %79 = vector.broadcast %cst_49 : f32 to vector<8x1xf32>
      %80 = arith.mulf %79, %78 : vector<8x1xf32>
      %81 = arith.subf %80, %52 : vector<8x1xf32>
      %82 = arith.cmpf olt, %69, %81 : vector<8x1xf32>
      %83 = vector.shape_cast %82 : vector<8x1xi1> to vector<8x1xi1>
      %84 = vector.broadcast %83 : vector<8x1xi1> to vector<8x16xi1>
      %85 = arith.select %84, %70, %51 : vector<8x16xi1>, vector<8x16xf32>
      %86 = arith.select %82, %80, %52 : vector<8x1xi1>, vector<8x1xf32>
      %87 = arith.extui %82 : vector<8x1xi1> to vector<8x1xi32>
      %88 = arith.addi %3, %87 : vector<8x1xi32>
      %c0_50 = arith.constant 0 : index
      %c0_51 = arith.constant 0 : index
      %89 = vector.load %arg11[%c0_50, %c0_51] : memref<8x16xf32, #tpu.memory_space<vmem>>, vector<8x16xf32>
      tpu.vector_store %arg11[%c0_50, %c0_51], %85 {strides = array<i32>} : memref<8x16xf32, #tpu.memory_space<vmem>>, vector<8x16xf32>,
      %c0_52 = arith.constant 0 : index
      %c0_53 = arith.constant 0 : index
      %90 = vector.load %arg12[%c0_52, %c0_53] : memref<8x1xf32, #tpu.memory_space<vmem>>, vector<8x1xf32>
      tpu.vector_store %arg12[%c0_52, %c0_53], %86 {strides = array<i32>} : memref<8x1xf32, #tpu.memory_space<vmem>>, vector<8x1xf32>,
      %c0_54 = arith.constant 0 : index
      %c0_55 = arith.constant 0 : index
      %91 = vector.load %arg10[%c0_54, %c0_55] : memref<8x1xi32, #tpu.memory_space<vmem>>, vector<8x1xi32>
      %92 = arith.addi %91, %88 : vector<8x1xi32>
      %c0_56 = arith.constant 0 : index
      %c0_57 = arith.constant 0 : index
      %93 = vector.load %arg10[%c0_56, %c0_57] : memref<8x1xi32, #tpu.memory_space<vmem>>, vector<8x1xi32>
      tpu.vector_store %arg10[%c0_56, %c0_57], %92 {strides = array<i32>} : memref<8x1xi32, #tpu.memory_space<vmem>>, vector<8x1xi32>,
    } else {
    }
    return
  }
  func.func @transform_0(%arg0: i32) -> (i32, i32) {
    %c0_i32 = arith.constant 0 : i32
    %c0_i32_0 = arith.constant 0 : i32
    %c0_i32_1 = arith.constant 0 : i32
    return %c0_i32, %c0_i32_0 : i32, i32
  }
  func.func @transform_1(%arg0: i32) -> (i32, i32) {
    %c0_i32 = arith.constant 0 : i32
    %c0_i32_0 = arith.constant 0 : i32
    %c0_i32_1 = arith.constant 0 : i32
    return %c0_i32, %c0_i32_0 : i32, i32
  }
  func.func @transform_2(%arg0: i32) -> (i32, i32) {
    %c0_i32 = arith.constant 0 : i32
    %c0_i32_0 = arith.constant 0 : i32
    %c0_i32_1 = arith.constant 0 : i32
    return %c0_i32, %c0_i32_0 : i32, i32
  }
  func.func @transform_3(%arg0: i32) -> (i32, i32) {
    %c0_i32 = arith.constant 0 : i32
    %c0_i32_0 = arith.constant 0 : i32
    %c0_i32_1 = arith.constant 0 : i32
    return %c0_i32, %c0_i32_0 : i32, i32
  }
  func.func @transform_4(%arg0: i32) -> (i32, i32, i32, i32) {
    %c0_i32 = arith.constant 0 : i32
    %c0_i32_0 = arith.constant 0 : i32
    %c0_i32_1 = arith.constant 0 : i32
    %c0_i32_2 = arith.constant 0 : i32
    return %arg0, %c0_i32, %c0_i32_0, %c0_i32_1 : i32, i32, i32, i32
  }
  func.func @transform_5(%arg0: i32) -> (i32, i32, i32, i32) {
    %c0_i32 = arith.constant 0 : i32
    %c0_i32_0 = arith.constant 0 : i32
    %c0_i32_1 = arith.constant 0 : i32
    %c0_i32_2 = arith.constant 0 : i32
    return %arg0, %c0_i32, %c0_i32_0, %c0_i32_1 : i32, i32, i32, i32
  }
  func.func @transform_6(%arg0: i32) -> (i32, i32, i32) {
    %c0_i32 = arith.constant 0 : i32
    %c0_i32_0 = arith.constant 0 : i32
    %c0_i32_1 = arith.constant 0 : i32
    %c0_i32_2 = arith.constant 0 : i32
    return %c0_i32, %c0_i32_0, %c0_i32_1 : i32, i32, i32
  }
  func.func @transform_7(%arg0: i32) -> (i32, i32, i32) {
    %c0_i32 = arith.constant 0 : i32
    %c0_i32_0 = arith.constant 0 : i32
    %c0_i32_1 = arith.constant 0 : i32
    %c0_i32_2 = arith.constant 0 : i32
    return %c0_i32, %c0_i32_0, %c0_i32_1 : i32, i32, i32
  }
  func.func @transform_8(%arg0: i32) -> (i32, i32, i32) {
    %c1_i32 = arith.constant 1 : i32
    %0 = arith.subi %arg0, %c1_i32 : i32
    %c0_i32 = arith.constant 0 : i32
    %1 = arith.maxsi %0, %c0_i32 : i32
    %c0_i32_0 = arith.constant 0 : i32
    %c0_i32_1 = arith.constant 0 : i32
    %c0_i32_2 = arith.constant 0 : i32
    return %1, %c0_i32_0, %c0_i32_1 : i32, i32, i32
  }
  func.func @transform_9(%arg0: i32) -> (i32, i32) {
    %c0_i32 = arith.constant 0 : i32
    %c0_i32_0 = arith.constant 0 : i32
    %c0_i32_1 = arith.constant 0 : i32
    return %c0_i32, %c0_i32_0 : i32, i32
  }
  func.func @transform_10(%arg0: i32) -> (i32, i32) {
    %c0_i32 = arith.constant 0 : i32
    %c0_i32_0 = arith.constant 0 : i32
    %c0_i32_1 = arith.constant 0 : i32
    return %c0_i32, %c0_i32_0 : i32, i32
  }
  func.func @transform_11(%arg0: i32) -> (i32, i32) {
    %c0_i32 = arith.constant 0 : i32
    %c0_i32_0 = arith.constant 0 : i32
    %c0_i32_1 = arith.constant 0 : i32
    return %c0_i32, %c0_i32_0 : i32, i32
  }
}

</mosaic_0001>

<bundles_post_ra>
// kernel: tpu_custom_call.1
= control target key start
LH: loop header
LB: loop body
LE: loop exit
PB: predicated region body
PF: predicated region fallthrough
CT: control target
= control target key end

     0   :  { %s1734_s0 = inlined_call_operand.hbm [shape: f32[8,16], index: 0, kind: input, shape index: {}]   ;;  %s1735_s1 = inlined_call_operand.vmem [shape: f32[16,32], index: 1, kind: input, shape index: {}]   ;;  %s1736_s2 = inlined_call_operand.vmem [shape: f32[1,32], index: 2, kind: input, shape index: {}]   ;;  %s1737_s3 = inlined_call_operand.vmem [shape: f32[1,32], index: 3, kind: input, shape index: {}]   ;;  %s1738_s4 = inlined_call_operand.vmem [shape: f32[4,2,8,16], index: 4, kind: input, shape index: {}]   ;;  %s1739_s5 = inlined_call_operand.vmem [shape: f32[4,2,8,1], index: 5, kind: input, shape index: {}]   ;;  %s1740_s6 = inlined_call_operand.vmem [shape: f32[2,8,16], index: 6, kind: input, shape index: {}]   ;;  %s1741_s7 = inlined_call_operand.vmem [shape: f32[2,8,1], index: 7, kind: input, shape index: {}]   ;;  %s1742_s8 = inlined_call_operand.hbm [shape: f32[3,8,16], index: 8, kind: output, shape index: {0}]   ;;  %s1743_s9 = inlined_call_operand.vmem [shape: s32[8,1], index: 9, kind: output, shape index: {1}]   ;;  %s1744_s10 = inlined_call_operand.hbm [shape: f32[8,16], index: 10, kind: output, shape index: {2}]   ;;  %s1745_s11 = inlined_call_operand.vmem [shape: f32[8,1], index: 11, kind: output, shape index: {3}]  }
   0x1   :  { %1754 = sst [smem:[#allocation14_spill]] %s1734_s0 }
   0x2   :  { %17 = vsyncpa [#allocation3], 0 }
   0x3   :  { %18 = vsyncpa [#allocation4], 0 }
   0x4   :  { %20 = vsyncpa [#allocation4 + $0x1], 0 }
   0x5   :  { %21 = vsyncpa [#allocation7], 0  ;;  %s1449_s17 = smov 0   ;;  %s1451_s18 = smov 0  }
   0x6   :  { %s1453_s19 = smov 0   ;;  %s1455_s20 = smov 0  }
   0x7 LB: > { %1755 = sst [smem:[#allocation11_spill]] %s1368_s19  ;;  %s1470_s21 = sadd.s32 4294967295, %s1372_s20   ;;  %s1372_s20 = sphi %s1455_s20, %s1774_s20   ;;  %s1368_s19 = sphi %s1453_s19, %s1776_s19   ;;  %s1364_s18 = sphi %s1451_s18, %s1778_s18   ;;  %s1360_s17 = sphi %s1449_s17, %s1777_s17  }
   0x8   : > { %s1065_s22 = sadd.s32 4294967294, %s1372_s20   ;;  %s1474_s23 = sadd.s32 1, %s1372_s20  }
   0x9   : > { %1756 = sst [smem:[#allocation12_spill]] %s1474_s23  ;;  %p210_p0 = scmp.gt.s32.totalorder %s1470_s21, 0 }
   0xa   : > { %s1067_s24 = sadd.s32 4294967295, %s1474_s23  ;;  %s218_s25 = sadd.s32 1, %s1368_s19 }
   0xb   : > { %s211_s26 = scalar_select %p210_p0, %s1470_s21, 0 }
   0xc   : > { %p213_p1 = scmp.gt.s32.totalorder %s1067_s24, 0  ;;  %p228_p2 = scmp.ne.s32.totalorder %s1368_s19, %s1364_s18 }
   0xd   : > { %p1746_p3 = scmp.eq.s32.totalorder %s1470_s21, 3  ;;  %p234_p4 = scmp.ne.s32.totalorder %s1364_s18, %s1360_s17 }
   0xe   : > { %s1780_s24 = smov (!%p213_p1, %s1067_s24), 0  ;;  %p235_p6 = scmp.eq.s32.totalorder %s1065_s22, 3 }
   0xf   : > { %p1487_p5 = por %p1746_p3, %p228_p2  ;;  %s215_s28 = ssub.s32 %s211_s26, %s1780_s24 }
  0x10   : > { %p1068_p7 = scmp.ge.s32.totalorder %s1372_s20, 1  ;;  %p216_p8 = scmp.eq.s32.totalorder %s215_s28, 0 }
  0x11   : > { %s1757_s27 = scalar_select %p1487_p5, 1, 0 }
  0x12   : > { %p1492_p9 = por %p235_p6, %p234_p4  ;;  %p305_p10 = scmp.lt.s32.totalorder %s1372_s20, 5 }
  0x13   : > { %s1499_s30 = scalar_select %p216_p8, %s1368_s19, %s218_s25  }
  0x14   : > { %s1758_s29 = scalar_select %p1492_p9, 1, 0 }
  0x15   : > { %1759 = sst [smem:[#allocation13_spill]] %s1499_s30  ;;  %p1501_p12 = pnand %p1068_p7, %p305_p10 }
  0x16   : > { %p1747_p13 = scmp.eq.s32.totalorder %s1470_s21, 0  ;;  %s1374_s13 = smov [#allocation2]  }
  0x17   : > { %s1760_s12 = scalar_select %p1501_p12, 1, 0 }
  0x18   : > { %p1174_p0 = pneg %p1501_p12  ;;  %s318_s14 = sshll.u32 %s1374_s13, 4  ;;  %s319_s14 = int_to_ptr.vmem [resolvable:$true] %s318_s14 }
  0x19   : > { %s1762_s0 = sld [smem:[#allocation14_spill]] }
  0x1a   : > { %p1510_p1 = pnand %p1747_p13, %p1174_p0 }
  0x1c   : > { %p1250_p4 = pneg %p1510_p1 }
  0x1f   : > { %s1248_s24 = scalar_lea.hbm %s1762_s0, 128 }
  0x20   : > { %p1249_p2 = scmp.ne.s32.totalorder %s1762_s0, %s1248_s24  ;;  %p1255_p8 = scmp.lt.u32.totalorder %s1248_s24, %s1762_s0 }
  0x22   : > { %p1251_p6 = pnand %p1250_p4, %p1249_p2 }
  0x24   : > { %p1252_p7 = pneg %p1251_p6 }
  0x26   : > { %p1257_p10 = pnand %p1255_p8, %p1252_p7 }
  0x28   : > { %1260 = shalt.err (!%p1257_p10)
}
  0x29   : > { %s1261_s30 = scalar_lea.vmem %s319_s14, 128  ;;  %p1269_p13 = scmp.lt.s32.totalorder %s319_s14, %s319_s14 }
  0x2a   : > { %p1262_p0 = scmp.ne.s32.totalorder %s319_s14, %s1261_s30  ;;  %p1270_p9 = scmp.lt.s32.totalorder %s1261_s30, %s1261_s30 }
  0x2c   : > { %p1264_p3 = pnand %p1262_p0, %p1250_p4  ;;  %p1271_p5 = por %p1270_p9, %p1269_p13 }
  0x2e   : > { %p1265_p11 = pneg %p1264_p3 }
  0x30   : > { %p1272_p12 = pnand %p1271_p5, %p1265_p11 }
  0x32   : > { %1275 = shalt.err (!%p1272_p12)
}
  0x33   : > { %1177 = dma.hbm_to_vmem [thread:$0]  (!%p1510_p1), %s1762_s0, 128, %s319_s14, [#allocation3]  }
  0x34   : > { %p1763_p2 = scmp.ne.s32.totalorder %s1760_s12, 0 }
  0x35   : > { %p1764_p6 = scmp.eq.s32.totalorder (!%p1763_p2), %s1470_s21, 0 }
  0x36   : > { %362 = sbr.rel (%p1763_p2) target bundleno = 2172 (0x87c), region = 52 }
  0x3d   : > { %1347 = dma.done.wait (%p1764_p6), [#allocation3], 128   ;;  %p1765_p4 = pmov %p1764_p6 }
  0x3e   : > { %s1750_s30 = sand.u32 1, %s1364_s18   ;;  %p407_p3 = scmp.lt.s32.totalorder %s1470_s21, 3  ;;  %v1556_v0 = vld [vmem:[%s1735_s1] sm:$0xff]  ;;  %v1561_v1 = vld [vmem:[%s1735_s1 + $0x8] sm:$0xff] }
  0x3f   : > { %1349 = vsyncadd (%p1765_p4), [#allocation3], 4294967168  ;;  %s1540_s15 = sshll.u32 %s1750_s30, 3  ;;  %v1566_v2 = vld [vmem:[%s1736_s2] sm:$0x1]  ;;  %p1766_p5 = scmp.ne.s32.totalorder %s1470_s21, 0 }
  0x40   : > { %s408_s14 = scalar_select %p407_p3, %s1470_s21, 3  ;;  %v1571_v3 = vld [vmem:[%s1737_s3] sm:$0x1] }
  0x41   : > { %427 = sbr.rel (%p1766_p5) target bundleno = 581 (0x245), region = 60  ;;  %v1150_v4 = vpack.c.bf16 (!%p1766_p5), %v1561_v1, %v1556_v0  ;;  %v428_v5 = vld [vmem:[#allocation2] sm:$0xff] (!%p1766_p5)  ;;  %v1375_v7 = vmov (!%p1766_p5), 0.0|0.0   ;;  %vm1376_vm0 = vmmov (!%p1766_p5), 0   ;;  %v1377_v8 = vmov (!%p1766_p5), 0.0  }
  0x42   : > { %s1097_s24 = sshll.u32 %s408_s14, 4  ;;  %v522_v6 = vld [vmem:[%s1740_s6] sm:$0xff] (!%p1766_p5)  ;;  %1149 = vmatprep.subr.bf16.mxu0 (!%p1766_p5), %v1375_v7  ;;  %1118 = vmatprep.mubr.msk.f32.mxu0 (!%p1766_p5), %vm1376_vm0, %v1377_v8  ;;  %vm435_vm1 = vcmask (!%p1766_p5), 130048   ;;  %v430_v10 = vlaneseq (!%p1766_p5)  ;;  %vm517_vm2 = vcmask (!%p1766_p5), 261120   ;;  %v1378_v27 = vmov (!%p1766_p5), 0  }
  0x43   : > { %s1546_s26 = scalar_lea.vmem %s1738_s4, %s1097_s24  ;;  %s1551_s16 = scalar_lea.vmem %s1739_s5, %s1097_s24  ;;  %1151 = vmatpush3.bf16.msra.mxu0 (!%p1766_p5), %v1150_v4  ;;  %1152 = vmatprep.subr.bf16.mxu1 (!%p1766_p5), %v1375_v7  ;;  %v524_v9 = vadd.f32 (!%p1766_p5), %v522_v6, %v428_v5  ;;  %v523_v32 = vld [vmem:[%s1741_s7] sm:$0xff] (!%p1766_p5)  ;;  %vm614_vm3 = vcmask (!%p1766_p5), 7168  }
  0x44   : > { %s400_s24 = scalar_lea.vmem [#allocation5], %s1540_s15  ;;  %1154 = vmatpush3.bf16.msra.mxu1 (!%p1766_p5), %v1150_v4  ;;  %1125 = vmatprep.mubr.msk.f32.mxu1 (!%p1766_p5), %vm1376_vm0, %v1377_v8  ;;  %v431_v11 = vshrl.u32 (!%p1766_p5), %v430_v10, 7 }
  0x45   : > { %1233 = vset.pattern.permute.xlu1 (!%p1766_p5), %v1378_v27  ;;  %1234 = vset.pattern.permute.xlu0 (!%p1766_p5), %v1378_v27 }
  0x46   : > { %1119 = vmatmul.mubr.msk.f32.vlgmr.msra.gmra.mrb[0].mxu0 (!%p1766_p5), %vm435_vm1, %v428_v5  ;;  %v432_v12 = vsub.s32 (!%p1766_p5), 0, %v431_v11 }
  0x47   : > { %1126 = vmatmul.mubr.msk.f32.vlgmr.msra.gmra.mrb[0].mxu1 (!%p1766_p5), %vm435_vm1, %v524_v9 }
  0x48   : > { %v433_v13 = vrot.slane %v1566_v2, %v432_v12  ;;  %v514_v20 = vrot.slane %v1571_v3, %v432_v12 }
 0x119   : > { %v505_v14 = vpop.f32.mrb[0].mxu0 }
 0x11a   : > { %v506_v15 = vadd.f32 %v505_v14, %v433_v13  ;;  %v1120_v16 = vpop.f32.mrb[1].mxu0  ;;  %v594_v17 = vpop.f32.mrb[0].mxu1 }
 0x11b   : > { %v595_v18 = vadd.f32 %v594_v17, %v433_v13  ;;  %v1127_v19 = vpop.f32.mrb[1].mxu1 }
 0x11c   : > { %1235 = vtanh.f32 %v506_v15 }
 0x11d   : > { %1237 = vtanh.f32 %v595_v18 }
 0x126   : > { %v1236_v21 = vpop.eup %1235 }
 0x127   : > { %v1238_v22 = vpop.eup %1237  ;;  %v516_v23 = vmul.f32 %v1236_v21, %v514_v20 }
 0x128   : > { %v599_v24 = vmul.f32 %v1238_v22, %v514_v20 }
 0x129   : > { %v518_v25 = vsel %vm517_vm2, %v516_v23, 0.0 }
 0x12a   : > { %519 = vadd.xlane.f32.xlu0 %v518_v25  ;;  %v600_v26 = vsel %vm517_vm2, %v599_v24, 0.0 }
 0x12e   : > { %601 = vadd.xlane.f32.xlu0 %v600_v26 }
 0x1b7   : > { %v520_v28 = vpop.xlane.xlu0 %519 }
 0x1b8   : > { %v521_v30 = vmul.f32 2.0, %v520_v28 }
 0x1bb   : > { %v602_v29 = vpop.xlane.xlu0 %601 }
 0x1bc   : > { %v603_v31 = vmul.f32 2.0, %v602_v29 }
 0x1be   : > { %v604_v33 = vsub.f32 %v603_v31, %v521_v30 }
 0x1c0   : > { %vm605_vm4 = vcmp.lt.f32.partialorder %v523_v32, %v604_v33 }
 0x1c1   : > { %v606_v34 = vsel %vm605_vm4, 1, %v1378_v27  ;;  %v612_v35 = vsel %vm605_vm4, %v603_v31, %v521_v30 }
 0x1c2   : > { %615 = vst.msk [vmem:[%s1745_s11] sm:$0xff] %vm614_vm3, %v612_v35  ;;  %608 = vperm.xlu1 %1233, %v606_v34   ;;  %616 = vst.msk [vmem:[%s1743_s9] sm:$0xff] %vm614_vm3, %v606_v34 }
 0x241   : > { %v609_v36 = vpop.permute.xlu1 %608 }
 0x242   : > { %vm610_vm5 = vcmp.eq.s32.totalorder %v609_v36, 1 }
 0x243   : > { %v611_v37 = vsel %vm610_vm5, %v524_v9, %v428_v5 }
 0x244   : > { %613 = vst.msk [vmem:[#allocation6] sm:$0xff] %vm435_vm1, %v611_v37 }
 0x245 PF: > { %v1597_v38 = vpack.c.bf16 %v1561_v1, %v1556_v0  ;;  %v619_v40 = vld [vmem:[%s1546_s26] sm:$0xff]  ;;  %v1379_v41 = vmov 0.0|0.0   ;;  %vm1380_vm6 = vmmov 0   ;;  %v1381_v42 = vmov 0.0   ;;  %v1082_v63 = vld [vmem:[%s1546_s26 + $0x8] sm:$0xff]  ;;  %p1085_p9 = scmp.lt.s32.totalorder %s1470_s21, 1 }
 0x246   : > { %1155 = vmatprep.subr.bf16.mxu0 %v1379_v41  ;;  %1132 = vmatprep.mubr.msk.f32.mxu0 %vm1380_vm6, %v1381_v42  ;;  %vm628_vm7 = vcmask 130048   ;;  %v623_v44 = vlaneseq  ;;  %vm710_vm8 = vcmask 261120   ;;  %v1382_v55 = vmov 0   ;;  %v618_v56 = vld [vmem:[%s1745_s11] sm:$0xff]  ;;  %v1083_v11 = vld [vmem:[%s1551_s16 + $0x8] sm:$0xff] }
 0x247   : > { %1157 = vmatpush3.bf16.msra.mxu0 %v1597_v38  ;;  %1158 = vmatprep.subr.bf16.mxu1 %v1379_v41  ;;  %v620_v59 = vld [vmem:[%s1551_s16] sm:$0xff]  ;;  %vm819_vm11 = vcmask 7168  }
 0x248   : > { %1160 = vmatpush3.bf16.msra.mxu1 %v1597_v38  ;;  %1139 = vmatprep.mubr.msk.f32.mxu1 %vm1380_vm6, %v1381_v42  ;;  %v624_v45 = vshrl.u32 %v623_v44, 7  ;;  %v821_v15 = vld [vmem:[%s1743_s9] sm:$0xff] }
 0x249   : > { %1239 = vset.pattern.permute.xlu0 %v1382_v55  ;;  %1240 = vset.pattern.permute.xlu1 %v1382_v55 }
 0x24a   : > { %v625_v46 = vsub.s32 0, %v624_v45 }
 0x24b   : > { %v617_v39 = vld [vmem:[#allocation6] sm:$0xff] }
 0x24c   : > { %v621_v43 = vadd.f32 %v619_v40, %v617_v39  ;;  %v1604_v47 = vrot.slane %v1566_v2, %v625_v46  ;;  %v1608_v51 = vrot.slane %v1571_v3, %v625_v46 }
 0x24e   : > { %1133 = vmatmul.mubr.msk.f32.vlgmr.msra.gmra.mrb[0].mxu0 %vm628_vm7, %v621_v43 }
 0x321   : > { %v698_v48 = vpop.f32.mrb[0].mxu0 }
 0x322   : > { %v699_v49 = vadd.f32 %v698_v48, %v1604_v47  ;;  %v1134_v50 = vpop.f32.mrb[1].mxu0 }
 0x324   : > { %1241 = vtanh.f32 %v699_v49 }
 0x32e   : > { %v1242_v52 = vpop.eup %1241 }
 0x32f   : > { %v709_v53 = vmul.f32 %v1242_v52, %v1608_v51 }
 0x331   : > { %v711_v54 = vsel %vm710_vm8, %v709_v53, 0.0 }
 0x332   : > { %712 = vadd.xlane.f32.xlu0 %v711_v54 }
 0x3bf   : > { %v713_v57 = vpop.xlane.xlu0 %712 }
 0x3c0   : > { %v714_v58 = vmul.f32 2.0, %v713_v57 }
 0x3c2   : > { %v715_v60 = vsub.f32 %v714_v58, %v618_v56 }
 0x3c4   : > { %vm716_vm9 = vcmp.lt.f32.partialorder %v620_v59, %v715_v60 }
 0x3c5   : > { %v717_v61 = vsel %vm716_vm9, 1, %v1382_v55  ;;  %v723_v62 = vsel %vm716_vm9, %v714_v58, %v618_v56 }
 0x3c6   : > { %719 = vperm.xlu0 %1239, %v717_v61  }
 0x445   : > { %v720_v0 = vpop.permute.xlu0 %719 }
 0x446   : > { %vm721_vm10 = vcmp.eq.s32.totalorder %v720_v0, 1 }
 0x447   : > { %v722_v1 = vsel %vm721_vm10, %v621_v43, %v617_v39 }
 0x448   : > { %v728_v2 = vadd.f32 %v1082_v63, %v722_v1 }
 0x44a   : > { %1140 = vmatmul.mubr.msk.f32.vlgmr.msra.gmra.mrb[0].mxu1 %vm628_vm7, %v728_v2 }
 0x51d   : > { %v798_v3 = vpop.f32.mrb[0].mxu1 }
 0x51e   : > { %v799_v4 = vadd.f32 %v798_v3, %v1604_v47  ;;  %v1141_v5 = vpop.f32.mrb[1].mxu1 }
 0x520   : > { %1243 = vtanh.f32 %v799_v4 }
 0x52a   : > { %v1244_v6 = vpop.eup %1243 }
 0x52b   : > { %v803_v7 = vmul.f32 %v1244_v6, %v1608_v51 }
 0x52d   : > { %v804_v8 = vsel %vm710_vm8, %v803_v7, 0.0 }
 0x52e   : > { %805 = vadd.xlane.f32.xlu1 %v804_v8 }
 0x5bb   : > { %v806_v9 = vpop.xlane.xlu1 %805 }
 0x5bc   : > { %v807_v10 = vmul.f32 2.0, %v806_v9 }
 0x5be   : > { %v808_v12 = vsub.f32 %v807_v10, %v723_v62 }
 0x5c0   : > { %vm809_vm12 = vcmp.lt.f32.partialorder %v1083_v11, %v808_v12 }
 0x5c1   : > { %v810_v13 = vsel %vm809_vm12, 1, %v1382_v55  ;;  %v816_v14 = vsel %vm809_vm12, %v807_v10, %v723_v62 }
 0x5c2   : > { %820 = vst.msk [vmem:[%s1745_s11] sm:$0xff] %vm819_vm11, %v816_v14  ;;  %812 = vperm.xlu1 %1240, %v810_v13   ;;  %v817_v16 = vadd.s32 %v810_v13, %v717_v61 }
 0x5c4   : > { %v822_v17 = vadd.s32 %v821_v15, %v817_v16 }
 0x5c6   : > { %823 = vst.msk [vmem:[%s1743_s9] sm:$0xff] %vm819_vm11, %v822_v17 }
 0x63e   : > { %827 = sbr.rel (%p1085_p9) target bundleno = 1605 (0x645), region = 64 }
 0x641   : > { %v813_v18 = vpop.permute.xlu1 %812 }
 0x642   : > { %vm814_vm13 = vcmp.eq.s32.totalorder %v813_v18, 1 }
 0x643   : > { %v815_v19 = vsel %vm814_vm13, %v728_v2, %v722_v1 }
 0x644   : > { %818 = vst.msk [vmem:[#allocation6] sm:$0xff] %vm628_vm7, %v815_v19  ;;  %828 = vst.msk [vmem:[%s400_s24] sm:$0xff] (!%p1085_p9), %vm628_vm7, %v815_v19 }
 0x645 PF: > { %p1086_p11 = scmp.ne.s32.totalorder %s1470_s21, 3 }
 0x646   : > { %v1087_v20 = vld [vmem:[%s1740_s6 + $0x8] sm:$0xff] (!%p1086_p11)  ;;  %v1383_v21 = vmov (!%p1086_p11), 0.0|0.0   ;;  %vm1384_vm14 = vmmov (!%p1086_p11), 0   ;;  %v1385_v22 = vmov (!%p1086_p11), 0.0   ;;  %v1386_v30 = vmov (!%p1086_p11), 0   ;;  %v928_v35 = vld [vmem:[%s1743_s9] sm:$0xff] (!%p1086_p11) }
 0x647   : > { %832 = sbr.rel (%p1086_p11) target bundleno = 2118 (0x846), region = 68  ;;  %1161 = vmatprep.subr.bf16.mxu0 (!%p1086_p11), %v1383_v21  ;;  %1146 = vmatprep.mubr.msk.f32.mxu0 (!%p1086_p11), %vm1384_vm14, %v1385_v22  ;;  %v837_v23 = vadd.f32 (!%p1086_p11), %v1087_v20, %v815_v19  ;;  %v1088_v33 = vld [vmem:[%s1741_s7 + $0x8] sm:$0xff] (!%p1086_p11) }
 0x648   : > { %1163 = vmatpush3.bf16.msra.mxu0 (!%p1086_p11), %v1597_v38  ;;  %1245 = vset.pattern.permute.xlu0 (!%p1086_p11), %v1386_v30 }
 0x64b   : > { %1147 = vmatmul.mubr.msk.f32.vlgmr.msra.gmra.mrb[0].mxu0 (!%p1086_p11), %vm628_vm7, %v837_v23 }
 0x71e   : > { %v907_v24 = vpop.f32.mrb[0].mxu0 }
 0x71f   : > { %v908_v25 = vadd.f32 %v907_v24, %v1604_v47  ;;  %v1148_v26 = vpop.f32.mrb[1].mxu0 }
 0x721   : > { %1246 = vtanh.f32 %v908_v25 }
 0x72b   : > { %v1247_v27 = vpop.eup %1246 }
 0x72c   : > { %v912_v28 = vmul.f32 %v1247_v27, %v1608_v51 }
 0x72e   : > { %v913_v29 = vsel %vm710_vm8, %v912_v28, 0.0 }
 0x72f   : > { %914 = vadd.xlane.f32.xlu0 %v913_v29 }
 0x7bc   : > { %v915_v31 = vpop.xlane.xlu0 %914 }
 0x7bd   : > { %v916_v32 = vmul.f32 2.0, %v915_v31 }
 0x7bf   : > { %v917_v34 = vsub.f32 %v916_v32, %v816_v14 }
 0x7c1   : > { %vm918_vm15 = vcmp.lt.f32.partialorder %v1088_v33, %v917_v34 }
 0x7c2   : > { %v925_v36 = vsel %vm918_vm15, %v916_v32, %v816_v14  ;;  %v919_v37 = vsel %vm918_vm15, 1, %v1386_v30 }
 0x7c3   : > { %927 = vst.msk [vmem:[%s1745_s11] sm:$0xff] %vm819_vm11, %v925_v36  ;;  %v929_v38 = vadd.s32 %v928_v35, %v919_v37  ;;  %921 = vperm.xlu0 %1245, %v919_v37  }
 0x7c5   : > { %930 = vst.msk [vmem:[%s1743_s9] sm:$0xff] %vm819_vm11, %v929_v38 }
 0x842   : > { %v922_v39 = vpop.permute.xlu0 %921 }
 0x843   : > { %vm923_vm0 = vcmp.eq.s32.totalorder %v922_v39, 1 }
 0x844   : > { %v924_v40 = vsel %vm923_vm0, %v837_v23, %v815_v19 }
 0x845   : > { %926 = vst.msk [vmem:[#allocation6] sm:$0xff] %vm628_vm7, %v924_v40 }
 0x846 PF: > { %s1091_s30 = sadd.s32 4294967295, %s1470_s21  ;;  %s948_s16 = sshll.u32 %s400_s24, 4  ;;  %s1665_s16 = int_to_ptr.vmem [resolvable:$true] %s948_s16 }
 0x847   : > { %p940_p12 = scmp.gt.s32.totalorder %s1091_s30, 0  ;;  %s1387_s28 = smov [#allocation6]  }
 0x848   : > { %s962_s13 = sshll.u32 %s1387_s28, 4  ;;  %s1767_s26 = sand.u32 1, %s1364_s18   ;;  %s1667_s13 = int_to_ptr.vmem [resolvable:$true] %s962_s13 }
 0x849   : > { %s1782_s30 = smov (!%p940_p12, %s1091_s30), 0  ;;  %s932_s0 = scalar_lea.sflag [#allocation4], %s1767_s26 }
 0x84a   : > { %s1092_s22 = sshll.u32 %s1782_s30, 7  ;;  %s1276_s19 = scalar_lea.vmem %s1665_s16, 128 }
 0x84b   : > { %s946_s25 = scalar_lea.hbm %s1742_s8, %s1092_s22  ;;  %p1277_p13 = scmp.ne.s32.totalorder %s1665_s16, %s1276_s19 }
 0x84c   : > { %p1768_p1 = scmp.ne.s32.totalorder %s1757_s27, 0  ;;  %s1388_s15 = smov [#allocation5]  }
 0x84d   : > { %s1280_s24 = sshll.u32 %s1388_s15, 4  ;;  %s1281_s24 = int_to_ptr.vmem [resolvable:$false] %s1280_s24 }
 0x84e   : > { %p1278_p7 = pnand %p1277_p13, %p1768_p1  ;;  %s1282_s23 = scalar_lea.vmem %s1281_s24, 256 }
 0x84f   : > { %p1283_p10 = scmp.lt.s32.totalorder %s1665_s16, %s1281_s24  ;;  %p1284_p0 = scmp.lt.s32.totalorder %s1282_s23, %s1276_s19 }
 0x850   : > { %p1279_p8 = pneg %p1278_p7 }
 0x851   : > { %p1285_p2 = por %p1284_p0, %p1283_p10 }
 0x853   : > { %p1286_p6 = pnand %p1285_p2, %p1279_p8 }
 0x855   : > { %1289 = shalt.err (!%p1286_p6)
}
 0x856   : > { %s1290_s30 = scalar_lea.hbm %s946_s25, 128  ;;  %s1294_s14 = scalar_lea.hbm %s1742_s8, 384 }
 0x857   : > { %p1291_p4 = scmp.ne.s32.totalorder %s946_s25, %s1290_s30  ;;  %p1295_p9 = scmp.lt.u32.totalorder %s946_s25, %s1742_s8 }
 0x858   : > { %p1296_p11 = scmp.lt.u32.totalorder %s1294_s14, %s1290_s30  ;;  %p1298_p13 = scmp.lt.u32.totalorder %s1290_s30, %s946_s25 }
 0x859   : > { %p1292_p3 = pnand %p1291_p4, %p1768_p1 }
 0x85a   : > { %p1297_p12 = por %p1296_p11, %p1295_p9 }
 0x85b   : > { %p1293_p5 = pneg %p1292_p3 }
 0x85c   : > { %p1299_p7 = por %p1298_p13, %p1297_p12 }
 0x85e   : > { %p1300_p8 = pnand %p1299_p7, %p1293_p5 }
 0x860   : > { %1303 = shalt.err (!%p1300_p8)
}
 0x861   : > { %1168 = dma.vmem_to_hbm [thread:$0]  (%p1768_p1), %s1665_s16, 128, %s946_s25, %s932_s0  }
 0x862   : > { %s1304_s19 = scalar_lea.vmem %s1667_s13, 128  ;;  %p1769_p0 = scmp.eq.s32.totalorder %s1470_s21, 3 }
 0x863   : > { %p1305_p10 = scmp.ne.s32.totalorder %s1667_s13, %s1304_s19  ;;  %p1311_p4 = scmp.lt.s32.totalorder %s1667_s13, %s1667_s13 }
 0x864   : > { %p1312_p3 = scmp.lt.s32.totalorder %s1304_s19, %s1304_s19 }
 0x865   : > { %p1306_p2 = pnand %p1305_p10, %p1769_p0 }
 0x866   : > { %p1313_p9 = por %p1312_p3, %p1311_p4 }
 0x867   : > { %p1307_p6 = pneg %p1306_p2 }
 0x869   : > { %p1314_p11 = pnand %p1313_p9, %p1307_p6 }
 0x86b   : > { %1317 = shalt.err (!%p1314_p11)
}
 0x86c   : > { %s1318_s27 = scalar_lea.hbm %s1744_s10, 128  ;;  %p1770_p5 = pmov %p1769_p0 }
 0x86d   : > { %p1319_p1 = scmp.ne.s32.totalorder %s1744_s10, %s1318_s27  ;;  %p1324_p7 = scmp.lt.u32.totalorder %s1318_s27, %s1744_s10 }
 0x86f   : > { %p1320_p12 = pnand %p1319_p1, %p1770_p5 }
 0x871   : > { %p1321_p13 = pneg %p1320_p12 }
 0x873   : > { %p1326_p8 = pnand %p1324_p7, %p1321_p13 }
 0x875   : > { %1329 = shalt.err (!%p1326_p8)
}
 0x876   : > { %p1771_p10 = pmov %p1769_p0 }
 0x878   : > { %1170 = dma.vmem_to_hbm [thread:$0]  (%p1771_p10), %s1667_s13, 128, %s1744_s10, [#allocation7]  }
 0x879   : > { %1351 = dma.done.wait (%p1769_p0), [#allocation7], 128   ;;  %p1772_p2 = pmov %p1769_p0 }
 0x87b   : > { %1353 = vsyncadd (%p1772_p2), [#allocation7], 4294967168 }
 0x87c PF: > { %p1186_p6 = scmp.ge.s32.totalorder %s1372_s20, 2  ;;  %s987_s22 = sand.u32 1, %s1360_s17  }
 0x87d   : > { %p1773_p4 = scmp.ne.s32.totalorder %s1758_s29, 0  ;;  %s988_s14 = scalar_lea.sflag [#allocation4], %s987_s22 }
 0x87f   : > { %p1179_p3 = pnand %p1186_p6, %p1773_p4 }
 0x881   : > { %1355 = dma.done.wait (!%p1179_p3), %s988_s14, 128  }
 0x882   : > { %1357 = vsyncadd (!%p1179_p3), %s988_s14, 4294967168  ;;  %s1774_s20 = sld [smem:[#allocation12_spill]]  ;;  %s1775_s12 = sld [smem:[#allocation11_spill]] }
 0x883   : > { %s1776_s19 = sld [smem:[#allocation13_spill]]  ;;  %s1777_s17 = smov %s1364_s18 }
 0x888   : > { %p24_p9 = scmp.ge.s32.totalorder %s1774_s20, 6   ;;  %s1778_s18 = smov %s1775_s12 }
 0x88a   :  { %26 = sbr.rel (!%p24_p9) target bundleno = 7 (0x7), region = 135 }
 0x891   :  { %993 = vsyncpa [#allocation3], 1 }
 0x892   :  { %995 = vsyncpa [#allocation3 + $0x1], 1 }
 0x893   :  { %996 = vsyncpa [#allocation4], 1 }
 0x894   :  { %998 = vsyncpa [#allocation4 + $0x1], 1 }
 0x895   :  { %999 = vsyncpa [#allocation7], 1 }

</bundles_post_ra>
